<compile_context>
chip_gen: v6e
topology: v6e:2x2x1
jax: 0.10.0
libtpu: 0.0.40
codegen_flags: <defaults>
</compile_context>

<pallas_src>
import functools

import jax
import jax.numpy as jnp
import numpy as np
from jax.experimental import pallas as pl
from jax.experimental.pallas import tpu as pltpu

# ---------------- module-consistent configuration ---------------------------
M = 4            # space_state_size
N = 2            # observation_vector_size
IN_MULT = 2      # system_config.input_dim_mult_KNet
OUT_MULT = 2     # system_config.output_dim_mult_KNet
BATCH = 8        # fills the 8 vreg sublanes
T_STEPS = 16     # sequence length handled by one kernel launch
DELTA_T = 0.1

M2 = M * M                      # d_hidden_Q == d_hidden_Sigma
N2 = N * N                      # d_hidden_S
D_IN_Q = M * IN_MULT            # GRU_Q input
D_IN_SIGMA = M2 + M * IN_MULT   # GRU_Sigma input
D_IN_S = N2 + 2 * N * IN_MULT   # GRU_S input
D_FC2_IN = N2 + M2
D_FC2_HID = D_FC2_IN * OUT_MULT
D_FC2_OUT = N * M
D_FC3_IN = N2 + D_FC2_OUT
D_FC4_IN = M2 + M2
D_FC7_IN = 2 * N
D_FC7_OUT = 2 * N * IN_MULT

# ---------------- packed-slab layouts (all static) --------------------------
_W_COLS = max(4 * M2, D_FC2_HID)          # 64

_W_ENTRIES = [
    ("W56", 2 * M, 2 * M * IN_MULT),      # FC5 ++ FC6 (block diagonal)
    ("W7", D_FC7_IN, D_FC7_OUT),
    ("W1", M2, N2),
    ("W2A", D_FC2_IN, D_FC2_HID),
    ("W2B", D_FC2_HID, D_FC2_OUT),
    ("W3", D_FC3_IN, M2),
    ("W4", D_FC4_IN, M2),
    ("GQ", D_IN_Q + M2, 4 * M2),          # fused GRU weights (r|z|n_x|n_h)
    ("GSIG", D_IN_SIGMA + M2, 4 * M2),
    ("GS", D_IN_S + N2, 4 * N2),
    ("FT", M, M),                         # F^T  (f dynamics)
    ("HT", M, N),                         # H^T  (h observation)
    ("SEL", M * N, M),                    # segment-sum for bmm(KGain, dy)
]


def _build_w_layout(entries):
    layout, off = {}, 0
    for name, rows, cols in entries:
        layout[name] = (off, rows, cols)
        off += ((rows + 7) // 8) * 8      # keep every block 8-sublane aligned
    return layout, off


_W_LAYOUT, _W_ROWS = _build_w_layout(_W_ENTRIES)

_B_ENTRIES = [
    ("B56", 2 * M * IN_MULT), ("B7", D_FC7_OUT), ("B1", N2),
    ("B2A", D_FC2_HID), ("B2B", D_FC2_OUT), ("B3", M2), ("B4", M2),
    ("BGQ", 4 * M2), ("BGSIG", 4 * M2), ("BGS", 4 * N2),
]
_B_LAYOUT = {name: (i, c) for i, (name, c) in enumerate(_B_ENTRIES)}
_B_ROWS = len(_B_ENTRIES)

_S_ENTRIES = [
    ("xpost", M), ("xpost_prev", M), ("xprior_prev", M), ("yprev", N),
    ("hq", M2), ("hsig", M2), ("hs", N2),
]
_S_LAYOUT = {}
_off = 0
for _name, _c in _S_ENTRIES:
    _S_LAYOUT[_name] = (_off, _c)
    _off += _c
_S_TOTAL = _off                           # 50


# ---------------- Pallas kernel: full T-step recurrence ---------------------
def _knet_seq_kernel(y_ref, s0_ref, w_ref, b_ref, traj_ref, sfin_ref):
    dot = functools.partial(jnp.dot, preferred_element_type=jnp.float32)

    def W(name):                                    # static VMEM window
        off, r, c = _W_LAYOUT[name]
        return w_ref[off:off + r, 0:c]

    ball = b_ref[...]                               # (10, 64) loaded once
    BIAS = {name: ball[i:i + 1, 0:c] for name, (i, c) in _B_LAYOUT.items()}

    def l2norm(x):      # == x / max(||x||_2, 1e-12)   (rsqrt -> EUP slot)
        ss = jnp.sum(x * x, axis=1, keepdims=True)
        return x * jnp.minimum(jax.lax.rsqrt(ss), 1e12)

    def lin_relu(x, wname, bname):
        return jnp.maximum(dot(x, W(wname)) + BIAS[bname], 0.0)

    def gru(x, h, wname, bname, dhid):
        # single fused matmul; PyTorch nn.GRU gate order (r, z, n)
        g = dot(jnp.concatenate([x, h], axis=1), W(wname)) + BIAS[bname]
        r = jax.nn.sigmoid(g[:, 0:dhid])
        z = jax.nn.sigmoid(g[:, dhid:2 * dhid])
        n = jnp.tanh(g[:, 2 * dhid:3 * dhid] + r * g[:, 3 * dhid:4 * dhid])
        return (1.0 - z) * n + z * h

    def step(y, xpost, xpost_prev, xprior_prev, yprev, hq, hsig, hs):
        # ---- step_prior (SysModel.f / SysModel.h folded in-kernel) ----
        xprior = xpost + DELTA_T * jnp.tanh(dot(xpost, W("FT")))
        m1y = dot(xprior, W("HT"))

        # ---- step_KGain_est: normalized difference features ----
        obs_diff = l2norm(y - yprev)
        obs_innov_diff = l2norm(y - m1y)
        fw_evol_diff = l2norm(xpost - xpost_prev)
        fw_update_diff = l2norm(xpost - xprior_prev)

        # FC7 first: independent of the GRU chain (scheduler can overlap it)
        out_fc7 = lin_relu(
            jnp.concatenate([obs_diff, obs_innov_diff], axis=1), "W7", "B7")
        # FC5 ++ FC6 fused via block-diagonal weight
        out56 = lin_relu(
            jnp.concatenate([fw_evol_diff, fw_update_diff], axis=1), "W56", "B56")
        out_fc5 = out56[:, 0:M * IN_MULT]
        out_fc6 = out56[:, M * IN_MULT:2 * M * IN_MULT]

        # ---- KGain_step chain ----
        hq_new = gru(out_fc5, hq, "GQ", "BGQ", M2)                    # out_Q
        hsig_new = gru(jnp.concatenate([hq_new, out_fc6], axis=1),
                       hsig, "GSIG", "BGSIG", M2)                      # out_Sigma
        out_fc1 = lin_relu(hsig_new, "W1", "B1")
        hs_new = gru(jnp.concatenate([out_fc1, out_fc7], axis=1),
                     hs, "GS", "BGS", N2)                              # out_S
        hid2 = lin_relu(jnp.concatenate([hsig_new, hs_new], axis=1), "W2A", "B2A")
        kg = dot(hid2, W("W2B")) + BIAS["B2B"]                         # FC2 (no ReLU)
        out_fc3 = lin_relu(jnp.concatenate([hs_new, kg], axis=1), "W3", "B3")
        out_fc4 = lin_relu(jnp.concatenate([hsig_new, out_fc3], axis=1),
                           "W4", "B4")                                 # next h_Sigma

        # ---- INOV = bmm(reshape(kg,(B,M,N)), dy); posterior update ----
        dy = y - m1y
        inov = dot(kg * jnp.tile(dy, (1, M)), W("SEL"))
        xpost_new = xprior + inov
        return kg, xpost_new, xprior, hq_new, out_fc4, hs_new

    s0 = s0_ref[...]

    def S(name):
        off, c = _S_LAYOUT[name]
        return s0[:, off:off + c]

    carry0 = (S("xpost"), S("xpost_prev"), S("xprior_prev"), S("yprev"),
              S("hq"), S("hsig"), S("hs"))

    def body(t, carry):
        xpost, xpost_prev, xprior_prev, yprev, hq, hsig, hs = carry
        y = y_ref[t]
        kg, xpost_new, xprior, hq_new, hsig_new, hs_new = step(
            y, xpost, xpost_prev, xprior_prev, yprev, hq, hsig, hs)
        traj_ref[t] = jnp.concatenate([xpost_new, kg], axis=1)
        # KNet_step state rotation
        return (xpost_new, xpost, xprior, y, hq_new, hsig_new, hs_new)

    final = jax.lax.fori_loop(0, y_ref.shape[0], body, carry0)
    sfin_ref[...] = jnp.concatenate(list(final), axis=1)


def knet_sequence_pallas(y_seq, s0, wslab, bslab):
    t = y_seq.shape[0]
    out_shapes = (
        jax.ShapeDtypeStruct((t, BATCH, M + M * N), jnp.float32),  # [post | KG]
        jax.ShapeDtypeStruct((BATCH, _S_TOTAL), jnp.float32),      # final state
    )
    return pl.pallas_call(
        _knet_seq_kernel,
        out_shape=out_shapes,
        in_specs=[pl.BlockSpec(memory_space=pltpu.MemorySpace.VMEM)] * 4,
        out_specs=(pl.BlockSpec(memory_space=pltpu.MemorySpace.VMEM),
                   pl.BlockSpec(memory_space=pltpu.MemorySpace.VMEM)),
    )(y_seq, s0, wslab, bslab)
    # TODO(synk): if many independent sequences are stacked, add a batch grid
    # axis marked "parallel" to shard across v7x's two TensorCores.


# ---------------- host-side weight packing ----------------------------------
def _fuse_gru_weight(gru_params, din, dhid):
    wih, whh = np.asarray(gru_params[0]), np.asarray(gru_params[1])
    w = np.zeros((din + dhid, 4 * dhid), np.float32)
    w[:din, 0:2 * dhid] = wih[:, 0:2 * dhid]          # r, z from x
    w[din:, 0:2 * dhid] = whh[:, 0:2 * dhid]          # r, z from h
    w[:din, 2 * dhid:3 * dhid] = wih[:, 2 * dhid:]    # n from x
    w[din:, 3 * dhid:4 * dhid] = whh[:, 2 * dhid:]    # n from h
    return w


def _fuse_gru_bias(gru_params, dhid):
    bih = np.asarray(gru_params[2]).ravel()
    bhh = np.asarray(gru_params[3]).ravel()
    return np.concatenate([bih[:2 * dhid] + bhh[:2 * dhid],
                           bih[2 * dhid:], bhh[2 * dhid:]])


def pack_params(raw):
    wslab = np.zeros((_W_ROWS, _W_COLS), np.float32)

    def put(name, mat):
        off, r, c = _W_LAYOUT[name]
        mat = np.asarray(mat, np.float32)
        assert mat.shape == (r, c), (name, mat.shape, (r, c))
        wslab[off:off + r, :c] = mat

    w56 = np.zeros((2 * M, 2 * M * IN_MULT), np.float32)
    w56[:M, :M * IN_MULT] = np.asarray(raw["w5"])
    w56[M:, M * IN_MULT:] = np.asarray(raw["w6"])
    put("W56", w56)
    put("W7", raw["w7"]); put("W1", raw["w1"])
    put("W2A", raw["w2a"]); put("W2B", raw["w2b"])
    put("W3", raw["w3"]); put("W4", raw["w4"])
    put("GQ", _fuse_gru_weight(raw["gq"], D_IN_Q, M2))
    put("GSIG", _fuse_gru_weight(raw["gsig"], D_IN_SIGMA, M2))
    put("GS", _fuse_gru_weight(raw["gs"], D_IN_S, N2))
    put("FT", np.asarray(raw["F"]).T)
    put("HT", np.asarray(raw["H"]).T)
    sel = np.zeros((M * N, M), np.float32)
    sel[np.arange(M * N), np.arange(M * N) // N] = 1.0
    put("SEL", sel)

    bslab = np.zeros((_B_ROWS, _W_COLS), np.float32)

    def putb(name, vec):
        i, c = _B_LAYOUT[name]
        vec = np.asarray(vec, np.float32).ravel()
        assert vec.shape == (c,), (name, vec.shape, c)
        bslab[i, :c] = vec

    putb("B56", np.concatenate([np.asarray(raw["b5"]).ravel(),
                                np.asarray(raw["b6"]).ravel()]))
    putb("B7", raw["b7"]); putb("B1", raw["b1"])
    putb("B2A", raw["b2a"]); putb("B2B", raw["b2b"])
    putb("B3", raw["b3"]); putb("B4", raw["b4"])
    putb("BGQ", _fuse_gru_bias(raw["gq"], M2))
    putb("BGSIG", _fuse_gru_bias(raw["gsig"], M2))
    putb("BGS", _fuse_gru_bias(raw["gs"], N2))
    return jnp.asarray(wslab), jnp.asarray(bslab)


# ---------------- deterministic parameter / state init ----------------------
def init_params(key):
    keys = jax.random.split(key, 12)

    def lin(k, din, dout):
        k1, k2 = jax.random.split(k)
        bound = 1.0 / (din ** 0.5)
        w = jax.random.uniform(k1, (din, dout), jnp.float32, -bound, bound)
        b = jax.random.uniform(k2, (1, dout), jnp.float32, -bound, bound)
        return w, b

    def gru(k, din, dhid):
        k1, k2, k3, k4 = jax.random.split(k, 4)
        bound = 1.0 / (dhid ** 0.5)
        wih = jax.random.uniform(k1, (din, 3 * dhid), jnp.float32, -bound, bound)
        whh = jax.random.uniform(k2, (dhid, 3 * dhid), jnp.float32, -bound, bound)
        bih = jax.random.uniform(k3, (1, 3 * dhid), jnp.float32, -bound, bound)
        bhh = jax.random.uniform(k4, (1, 3 * dhid), jnp.float32, -bound, bound)
        return wih, whh, bih, bhh

    w5, b5 = lin(keys[0], M, M * IN_MULT)
    w6, b6 = lin(keys[1], M, M * IN_MULT)
    w7, b7 = lin(keys[2], D_FC7_IN, D_FC7_OUT)
    w1, b1 = lin(keys[3], M2, N2)
    w2a, b2a = lin(keys[4], D_FC2_IN, D_FC2_HID)
    w2b, b2b = lin(keys[5], D_FC2_HID, D_FC2_OUT)
    w3, b3 = lin(keys[6], D_FC3_IN, M2)
    w4, b4 = lin(keys[7], D_FC4_IN, M2)
    gq = gru(keys[8], D_IN_Q, M2)
    gsig = gru(keys[9], D_IN_SIGMA, M2)
    gs = gru(keys[10], D_IN_S, N2)

    F_mat = jnp.eye(M, dtype=jnp.float32) * 0.9 + 0.05
    H_mat = jax.random.uniform(keys[11], (N, M), jnp.float32, -0.5, 0.5)
    return dict(w5=w5, b5=b5, w6=w6, b6=b6, w7=w7, b7=b7, w1=w1, b1=b1,
                w2a=w2a, b2a=b2a, w2b=w2b, b2b=b2b, w3=w3, b3=b3, w4=w4, b4=b4,
                gq=gq, gsig=gsig, gs=gs, F=F_mat, H=H_mat,
                prior_Q=jnp.eye(M, dtype=jnp.float32) * 0.1,
                prior_Sigma=jnp.eye(M, dtype=jnp.float32) * 0.1,
                prior_S=jnp.eye(N, dtype=jnp.float32) * 0.1)


def init_state_packed(raw, m1_0):        # InitSequence + init_hidden_KNet
    x0 = m1_0[..., 0]                                    # (B, M)
    y_prev = x0 @ raw["H"].T                             # h(m1_0)
    hq0 = jnp.tile(raw["prior_Q"].reshape(1, -1), (BATCH, 1))
    hsig0 = jnp.tile(raw["prior_Sigma"].reshape(1, -1), (BATCH, 1))
    hs0 = jnp.tile(raw["prior_S"].reshape(1, -1), (BATCH, 1))
    return jnp.concatenate([x0, x0, x0, y_prev, hq0, hsig0, hs0], axis=1)


# ---------------- pure-JAX reference (unfused weights, PyTorch semantics) ---
def _ref_step(dot, raw, y, xpost, xpost_prev, xprior_prev, yprev, hq, hsig, hs):
    def l2norm(x):
        nrm = jnp.sqrt(jnp.sum(x * x, axis=1, keepdims=True))
        return x / jnp.maximum(nrm, 1e-12)

    def lin_relu(x, w, b):
        return jnp.maximum(dot(x, w) + b, 0.0)

    def gru_cell(x, h, wih, whh, bih, bhh, hdim):
        gi = dot(x, wih) + bih
        gh = dot(h, whh) + bhh
        r = jax.nn.sigmoid(gi[:, :hdim] + gh[:, :hdim])
        z = jax.nn.sigmoid(gi[:, hdim:2 * hdim] + gh[:, hdim:2 * hdim])
        n = jnp.tanh(gi[:, 2 * hdim:] + r * gh[:, 2 * hdim:])
        return (1.0 - z) * n + z * h

    xprior = xpost + DELTA_T * jnp.tanh(dot(xpost, raw["F"].T))
    m1y = dot(xprior, raw["H"].T)

    obs_diff = l2norm(y - yprev)
    obs_innov_diff = l2norm(y - m1y)
    fw_evol_diff = l2norm(xpost - xpost_prev)
    fw_update_diff = l2norm(xpost - xprior_prev)

    out_fc5 = lin_relu(fw_evol_diff, raw["w5"], raw["b5"])
    hq_new = gru_cell(out_fc5, hq, *raw["gq"], M2)
    out_fc6 = lin_relu(fw_update_diff, raw["w6"], raw["b6"])
    hsig_new = gru_cell(jnp.concatenate([hq_new, out_fc6], axis=1), hsig,
                        *raw["gsig"], M2)
    out_fc1 = lin_relu(hsig_new, raw["w1"], raw["b1"])
    out_fc7 = lin_relu(jnp.concatenate([obs_diff, obs_innov_diff], axis=1),
                       raw["w7"], raw["b7"])
    hs_new = gru_cell(jnp.concatenate([out_fc1, out_fc7], axis=1), hs,
                      *raw["gs"], N2)
    hid2 = lin_relu(jnp.concatenate([hsig_new, hs_new], axis=1),
                    raw["w2a"], raw["b2a"])
    kg = dot(hid2, raw["w2b"]) + raw["b2b"]
    out_fc3 = lin_relu(jnp.concatenate([hs_new, kg], axis=1), raw["w3"], raw["b3"])
    out_fc4 = lin_relu(jnp.concatenate([hsig_new, out_fc3], axis=1),
                       raw["w4"], raw["b4"])

    dy = y - m1y
    inov = jnp.einsum("bmn,bn->bm", kg.reshape(BATCH, M, N), dy)
    xpost_new = xprior + inov
    return kg, xpost_new, xprior, hq_new, out_fc4, hs_new


def reference_sequence(raw, y_seq, s0):
    dot = functools.partial(jnp.dot, precision=jax.lax.Precision.HIGHEST)

    def sl(name):
        off, c = _S_LAYOUT[name]
        return s0[:, off:off + c]

    xpost, xpost_prev, xprior_prev, yprev = (sl("xpost"), sl("xpost_prev"),
                                             sl("xprior_prev"), sl("yprev"))
    hq, hsig, hs = sl("hq"), sl("hsig"), sl("hs")
    traj = []
    for t in range(y_seq.shape[0]):
        y = y_seq[t]
        kg, xpost_new, xprior_new, hq_new, hsig_new, hs_new = _ref_step(
            dot, raw, y, xpost, xpost_prev, xprior_prev, yprev, hq, hsig, hs)
        traj.append(jnp.concatenate([xpost_new, kg], axis=1))
        xpost_prev, xpost = xpost, xpost_new
        xprior_prev, yprev = xprior_new, y
        hq, hsig, hs = hq_new, hsig_new, hs_new
    sfin = jnp.concatenate([xpost, xpost_prev, xprior_prev, yprev, hq, hsig, hs],
                           axis=1)
    return jnp.stack(traj, axis=0), sfin


# ---------------- main -------------------------------------------------------
if __name__ == "__main__":
    key = jax.random.PRNGKey(0)
    kp, kx, ky = jax.random.split(key, 3)

    raw = init_params(kp)
    m1_0 = 0.1 * jax.random.normal(kx, (BATCH, M, 1), jnp.float32)
    y_seq = jax.random.normal(ky, (T_STEPS, BATCH, N), jnp.float32)

    s0 = init_state_packed(raw, m1_0)
    wslab, bslab = pack_params(raw)

    traj, sfin = knet_sequence_pallas(y_seq, s0, wslab, bslab)
    traj = jax.block_until_ready(traj)
    sfin = jax.block_until_ready(sfin)

    # pure-JAX reference of the same T-step recurrence (unfused weights)
    traj_ref, sfin_ref = reference_sequence(raw, y_seq, s0)
    np.testing.assert_allclose(np.asarray(traj), np.asarray(traj_ref),
                               rtol=2e-3, atol=2e-3)
    np.testing.assert_allclose(np.asarray(sfin), np.asarray(sfin_ref),
                               rtol=2e-3, atol=2e-3)

    # posterior trajectory in the PyTorch (B, M, 1) convention
    m1x_posterior_seq = traj[:, :, :M][..., None]
    assert m1x_posterior_seq.shape == (T_STEPS, BATCH, M, 1)
    print("KERNEL_OK")
</pallas_src>

<mosaic_0001>
module attributes {stable_mosaic.version = 11 : i64} {
  func.func @_knet_seq_kernel(%arg0: memref<16x8x2xf32, #tpu.memory_space<vmem>>, %arg1: memref<8x50xf32, #tpu.memory_space<vmem>>, %arg2: memref<248x64xf32, #tpu.memory_space<vmem>>, %arg3: memref<10x64xf32, #tpu.memory_space<vmem>>, %arg4: memref<16x8x12xf32, #tpu.memory_space<vmem>>, %arg5: memref<8x50xf32, #tpu.memory_space<vmem>>) attributes {dimension_semantics = [], scalar_prefetch = 0 : i64, scratch_operands = 0 : i64, tpu.core_type = #tpu.core_type<tc>} {
    %c0 = arith.constant 0 : index
    %c0_0 = arith.constant 0 : index
    %0 = vector.load %arg3[%c0, %c0_0] : memref<10x64xf32, #tpu.memory_space<vmem>>, vector<10x64xf32>
    %1 = vector.extract_strided_slice %0 {offsets = [0, 0], sizes = [1, 16], strides = [1, 1]} : vector<10x64xf32> to vector<1x16xf32>
    %2 = vector.extract_strided_slice %0 {offsets = [1, 0], sizes = [1, 8], strides = [1, 1]} : vector<10x64xf32> to vector<1x8xf32>
    %3 = vector.extract_strided_slice %0 {offsets = [2, 0], sizes = [1, 4], strides = [1, 1]} : vector<10x64xf32> to vector<1x4xf32>
    %4 = vector.extract_strided_slice %0 {offsets = [3, 0], sizes = [1, 40], strides = [1, 1]} : vector<10x64xf32> to vector<1x40xf32>
    %5 = vector.extract_strided_slice %0 {offsets = [4, 0], sizes = [1, 8], strides = [1, 1]} : vector<10x64xf32> to vector<1x8xf32>
    %6 = vector.extract_strided_slice %0 {offsets = [5, 0], sizes = [1, 16], strides = [1, 1]} : vector<10x64xf32> to vector<1x16xf32>
    %7 = vector.extract_strided_slice %0 {offsets = [6, 0], sizes = [1, 16], strides = [1, 1]} : vector<10x64xf32> to vector<1x16xf32>
    %8 = vector.extract_strided_slice %0 {offsets = [7, 0], sizes = [1, 64], strides = [1, 1]} : vector<10x64xf32> to vector<1x64xf32>
    %9 = vector.extract_strided_slice %0 {offsets = [8, 0], sizes = [1, 64], strides = [1, 1]} : vector<10x64xf32> to vector<1x64xf32>
    %10 = vector.extract_strided_slice %0 {offsets = [9, 0], sizes = [1, 16], strides = [1, 1]} : vector<10x64xf32> to vector<1x16xf32>
    %c0_1 = arith.constant 0 : index
    %c0_2 = arith.constant 0 : index
    %11 = vector.load %arg1[%c0_1, %c0_2] : memref<8x50xf32, #tpu.memory_space<vmem>>, vector<8x50xf32>
    %12 = vector.extract_strided_slice %11 {offsets = [0, 0], sizes = [8, 4], strides = [1, 1]} : vector<8x50xf32> to vector<8x4xf32>
    %13 = vector.extract_strided_slice %11 {offsets = [0, 4], sizes = [8, 4], strides = [1, 1]} : vector<8x50xf32> to vector<8x4xf32>
    %14 = vector.extract_strided_slice %11 {offsets = [0, 8], sizes = [8, 4], strides = [1, 1]} : vector<8x50xf32> to vector<8x4xf32>
    %15 = vector.extract_strided_slice %11 {offsets = [0, 12], sizes = [8, 2], strides = [1, 1]} : vector<8x50xf32> to vector<8x2xf32>
    %16 = vector.extract_strided_slice %11 {offsets = [0, 14], sizes = [8, 16], strides = [1, 1]} : vector<8x50xf32> to vector<8x16xf32>
    %17 = vector.extract_strided_slice %11 {offsets = [0, 30], sizes = [8, 16], strides = [1, 1]} : vector<8x50xf32> to vector<8x16xf32>
    %18 = vector.extract_strided_slice %11 {offsets = [0, 46], sizes = [8, 4], strides = [1, 1]} : vector<8x50xf32> to vector<8x4xf32>
    %c0_i32 = arith.constant 0 : i32
    %c16_i32 = arith.constant 16 : i32
    %19 = arith.addi %c0_i32, %c16_i32 : i32
    %c1_i32 = arith.constant 1 : i32
    %20:7 = scf.for %arg6 = %c0_i32 to %19 step %c1_i32 iter_args(%arg7 = %12, %arg8 = %13, %arg9 = %14, %arg10 = %15, %arg11 = %16, %arg12 = %17, %arg13 = %18) -> (vector<8x4xf32>, vector<8x4xf32>, vector<8x4xf32>, vector<8x2xf32>, vector<8x16xf32>, vector<8x16xf32>, vector<8x4xf32>)  : i32 {
      %23 = arith.index_cast %arg6 : i32 to index
      %c0_6 = arith.constant 0 : index
      %c0_7 = arith.constant 0 : index
      %24 = vector.load %arg0[%23, %c0_6, %c0_7] : memref<16x8x2xf32, #tpu.memory_space<vmem>>, vector<1x8x2xf32>
      %25 = vector.shape_cast %24 : vector<1x8x2xf32> to vector<8x2xf32>
      %c224 = arith.constant 224 : index
      %c0_8 = arith.constant 0 : index
      %26 = vector.load %arg2[%c224, %c0_8] : memref<248x64xf32, #tpu.memory_space<vmem>>, vector<4x4xf32>
      %cst = arith.constant dense<0.000000e+00> : vector<8x4xf32>
      %27 = tpu.matmul %arg7, %26, %cst {dimension_numbers = #tpu.dot_dimension_numbers<[1], [0], [0], [1], [0, 0, 1, 1], [], []>} : vector<8x4xf32>, vector<4x4xf32>, vector<8x4xf32> -> vector<8x4xf32>
      %28 = math.tanh %27 : vector<8x4xf32>
      %cst_9 = arith.constant 1.000000e-01 : f32
      %29 = vector.broadcast %cst_9 : f32 to vector<8x4xf32>
      %30 = arith.mulf %29, %28 : vector<8x4xf32>
      %31 = arith.addf %arg7, %30 : vector<8x4xf32>
      %c232 = arith.constant 232 : index
      %c0_10 = arith.constant 0 : index
      %32 = vector.load %arg2[%c232, %c0_10] : memref<248x64xf32, #tpu.memory_space<vmem>>, vector<4x2xf32>
      %cst_11 = arith.constant dense<0.000000e+00> : vector<8x2xf32>
      %33 = tpu.matmul %31, %32, %cst_11 {dimension_numbers = #tpu.dot_dimension_numbers<[1], [0], [0], [1], [0, 0, 1, 1], [], []>} : vector<8x4xf32>, vector<4x2xf32>, vector<8x2xf32> -> vector<8x2xf32>
      %34 = arith.subf %25, %arg10 : vector<8x2xf32>
      %35 = arith.mulf %34, %34 : vector<8x2xf32>
      %cst_12 = arith.constant dense<0.000000e+00> : vector<8xf32>
      %36 = vector.multi_reduction <add>, %35, %cst_12 [1] : vector<8x2xf32> to vector<8xf32>
      %37 = vector.shape_cast %36 : vector<8xf32> to vector<8x1xf32>
      %38 = math.rsqrt %37 : vector<8x1xf32>
      %cst_13 = arith.constant 9.99999995E+11 : f32
      %39 = vector.broadcast %cst_13 : f32 to vector<8x1xf32>
      %40 = arith.minimumf %38, %39 : vector<8x1xf32>
      %41 = vector.broadcast %40 : vector<8x1xf32> to vector<8x2xf32>
      %42 = arith.mulf %34, %41 : vector<8x2xf32>
      %43 = arith.subf %25, %33 : vector<8x2xf32>
      %44 = arith.mulf %43, %43 : vector<8x2xf32>
      %cst_14 = arith.constant dense<0.000000e+00> : vector<8xf32>
      %45 = vector.multi_reduction <add>, %44, %cst_14 [1] : vector<8x2xf32> to vector<8xf32>
      %46 = vector.shape_cast %45 : vector<8xf32> to vector<8x1xf32>
      %47 = math.rsqrt %46 : vector<8x1xf32>
      %cst_15 = arith.constant 9.99999995E+11 : f32
      %48 = vector.broadcast %cst_15 : f32 to vector<8x1xf32>
      %49 = arith.minimumf %47, %48 : vector<8x1xf32>
      %50 = vector.broadcast %49 : vector<8x1xf32> to vector<8x2xf32>
      %51 = arith.mulf %43, %50 : vector<8x2xf32>
      %52 = arith.subf %arg7, %arg8 : vector<8x4xf32>
      %53 = arith.mulf %52, %52 : vector<8x4xf32>
      %cst_16 = arith.constant dense<0.000000e+00> : vector<8xf32>
      %54 = vector.multi_reduction <add>, %53, %cst_16 [1] : vector<8x4xf32> to vector<8xf32>
      %55 = vector.shape_cast %54 : vector<8xf32> to vector<8x1xf32>
      %56 = math.rsqrt %55 : vector<8x1xf32>
      %cst_17 = arith.constant 9.99999995E+11 : f32
      %57 = vector.broadcast %cst_17 : f32 to vector<8x1xf32>
      %58 = arith.minimumf %56, %57 : vector<8x1xf32>
      %59 = vector.broadcast %58 : vector<8x1xf32> to vector<8x4xf32>
      %60 = arith.mulf %52, %59 : vector<8x4xf32>
      %61 = arith.subf %arg7, %arg9 : vector<8x4xf32>
      %62 = arith.mulf %61, %61 : vector<8x4xf32>
      %cst_18 = arith.constant dense<0.000000e+00> : vector<8xf32>
      %63 = vector.multi_reduction <add>, %62, %cst_18 [1] : vector<8x4xf32> to vector<8xf32>
      %64 = vector.shape_cast %63 : vector<8xf32> to vector<8x1xf32>
      %65 = math.rsqrt %64 : vector<8x1xf32>
      %cst_19 = arith.constant 9.99999995E+11 : f32
      %66 = vector.broadcast %cst_19 : f32 to vector<8x1xf32>
      %67 = arith.minimumf %65, %66 : vector<8x1xf32>
      %68 = vector.broadcast %67 : vector<8x1xf32> to vector<8x4xf32>
      %69 = arith.mulf %61, %68 : vector<8x4xf32>
      %70 = tpu.concatenate %42, %51 in 1 : vector<8x2xf32>, vector<8x2xf32> -> vector<8x4xf32>
      %c8 = arith.constant 8 : index
      %c0_20 = arith.constant 0 : index
      %71 = vector.load %arg2[%c8, %c0_20] : memref<248x64xf32, #tpu.memory_space<vmem>>, vector<4x8xf32>
      %cst_21 = arith.constant dense<0.000000e+00> : vector<8x8xf32>
      %72 = tpu.matmul %70, %71, %cst_21 {dimension_numbers = #tpu.dot_dimension_numbers<[1], [0], [0], [1], [0, 0, 1, 1], [], []>} : vector<8x4xf32>, vector<4x8xf32>, vector<8x8xf32> -> vector<8x8xf32>
      %73 = vector.broadcast %2 : vector<1x8xf32> to vector<8x8xf32>
      %74 = arith.addf %72, %73 : vector<8x8xf32>
      %cst_22 = arith.constant 0.000000e+00 : f32
      %75 = vector.broadcast %cst_22 : f32 to vector<8x8xf32>
      %76 = arith.maximumf %74, %75 : vector<8x8xf32>
      %77 = tpu.concatenate %60, %69 in 1 : vector<8x4xf32>, vector<8x4xf32> -> vector<8x8xf32>
      %c0_23 = arith.constant 0 : index
      %c0_24 = arith.constant 0 : index
      %78 = vector.load %arg2[%c0_23, %c0_24] : memref<248x64xf32, #tpu.memory_space<vmem>>, vector<8x16xf32>
      %cst_25 = arith.constant dense<0.000000e+00> : vector<8x16xf32>
      %79 = tpu.matmul %77, %78, %cst_25 {dimension_numbers = #tpu.dot_dimension_numbers<[1], [0], [0], [1], [0, 0, 1, 1], [], []>} : vector<8x8xf32>, vector<8x16xf32>, vector<8x16xf32> -> vector<8x16xf32>
      %80 = vector.broadcast %1 : vector<1x16xf32> to vector<8x16xf32>
      %81 = arith.addf %79, %80 : vector<8x16xf32>
      %cst_26 = arith.constant 0.000000e+00 : f32
      %82 = vector.broadcast %cst_26 : f32 to vector<8x16xf32>
      %83 = arith.maximumf %81, %82 : vector<8x16xf32>
      %84 = vector.extract_strided_slice %83 {offsets = [0, 0], sizes = [8, 8], strides = [1, 1]} : vector<8x16xf32> to vector<8x8xf32>
      %85 = vector.extract_strided_slice %83 {offsets = [0, 8], sizes = [8, 8], strides = [1, 1]} : vector<8x16xf32> to vector<8x8xf32>
      %86 = tpu.concatenate %84, %arg11 in 1 : vector<8x8xf32>, vector<8x16xf32> -> vector<8x24xf32>
      %c144 = arith.constant 144 : index
      %c0_27 = arith.constant 0 : index
      %87 = vector.load %arg2[%c144, %c0_27] : memref<248x64xf32, #tpu.memory_space<vmem>>, vector<24x64xf32>
      %cst_28 = arith.constant dense<0.000000e+00> : vector<8x64xf32>
      %88 = tpu.matmul %86, %87, %cst_28 {dimension_numbers = #tpu.dot_dimension_numbers<[1], [0], [0], [1], [0, 0, 1, 1], [], []>} : vector<8x24xf32>, vector<24x64xf32>, vector<8x64xf32> -> vector<8x64xf32>
      %89 = vector.broadcast %8 : vector<1x64xf32> to vector<8x64xf32>
      %90 = arith.addf %88, %89 : vector<8x64xf32>
      %91 = vector.extract_strided_slice %90 {offsets = [0, 0], sizes = [8, 16], strides = [1, 1]} : vector<8x64xf32> to vector<8x16xf32>
      %92 = arith.negf %91 : vector<8x16xf32>
      %93 = math.exp %92 : vector<8x16xf32>
      %cst_29 = arith.constant 1.000000e+00 : f32
      %94 = vector.broadcast %cst_29 : f32 to vector<8x16xf32>
      %95 = arith.addf %94, %93 : vector<8x16xf32>
      %96 = arith.divf %94, %95 : vector<8x16xf32>
      %97 = vector.extract_strided_slice %90 {offsets = [0, 16], sizes = [8, 16], strides = [1, 1]} : vector<8x64xf32> to vector<8x16xf32>
      %98 = arith.negf %97 : vector<8x16xf32>
      %99 = math.exp %98 : vector<8x16xf32>
      %cst_30 = arith.constant 1.000000e+00 : f32
      %100 = vector.broadcast %cst_30 : f32 to vector<8x16xf32>
      %101 = arith.addf %100, %99 : vector<8x16xf32>
      %102 = arith.divf %100, %101 : vector<8x16xf32>
      %103 = vector.extract_strided_slice %90 {offsets = [0, 32], sizes = [8, 16], strides = [1, 1]} : vector<8x64xf32> to vector<8x16xf32>
      %104 = vector.extract_strided_slice %90 {offsets = [0, 48], sizes = [8, 16], strides = [1, 1]} : vector<8x64xf32> to vector<8x16xf32>
      %105 = arith.mulf %96, %104 : vector<8x16xf32>
      %106 = arith.addf %103, %105 : vector<8x16xf32>
      %107 = math.tanh %106 : vector<8x16xf32>
      %cst_31 = arith.constant 1.000000e+00 : f32
      %108 = vector.broadcast %cst_31 : f32 to vector<8x16xf32>
      %109 = arith.subf %108, %102 : vector<8x16xf32>
      %110 = arith.mulf %109, %107 : vector<8x16xf32>
      %111 = arith.mulf %102, %arg11 : vector<8x16xf32>
      %112 = arith.addf %110, %111 : vector<8x16xf32>
      %113 = tpu.concatenate %112, %85 in 1 : vector<8x16xf32>, vector<8x8xf32> -> vector<8x24xf32>
      %114 = tpu.concatenate %113, %arg12 in 1 : vector<8x24xf32>, vector<8x16xf32> -> vector<8x40xf32>
      %c168 = arith.constant 168 : index
      %c0_32 = arith.constant 0 : index
      %115 = vector.load %arg2[%c168, %c0_32] : memref<248x64xf32, #tpu.memory_space<vmem>>, vector<40x64xf32>
      %cst_33 = arith.constant dense<0.000000e+00> : vector<8x64xf32>
      %116 = tpu.matmul %114, %115, %cst_33 {dimension_numbers = #tpu.dot_dimension_numbers<[1], [0], [0], [1], [0, 0, 1, 1], [], []>} : vector<8x40xf32>, vector<40x64xf32>, vector<8x64xf32> -> vector<8x64xf32>
      %117 = vector.broadcast %9 : vector<1x64xf32> to vector<8x64xf32>
      %118 = arith.addf %116, %117 : vector<8x64xf32>
      %119 = vector.extract_strided_slice %118 {offsets = [0, 0], sizes = [8, 16], strides = [1, 1]} : vector<8x64xf32> to vector<8x16xf32>
      %120 = arith.negf %119 : vector<8x16xf32>
      %121 = math.exp %120 : vector<8x16xf32>
      %cst_34 = arith.constant 1.000000e+00 : f32
      %122 = vector.broadcast %cst_34 : f32 to vector<8x16xf32>
      %123 = arith.addf %122, %121 : vector<8x16xf32>
      %124 = arith.divf %122, %123 : vector<8x16xf32>
      %125 = vector.extract_strided_slice %118 {offsets = [0, 16], sizes = [8, 16], strides = [1, 1]} : vector<8x64xf32> to vector<8x16xf32>
      %126 = arith.negf %125 : vector<8x16xf32>
      %127 = math.exp %126 : vector<8x16xf32>
      %cst_35 = arith.constant 1.000000e+00 : f32
      %128 = vector.broadcast %cst_35 : f32 to vector<8x16xf32>
      %129 = arith.addf %128, %127 : vector<8x16xf32>
      %130 = arith.divf %128, %129 : vector<8x16xf32>
      %131 = vector.extract_strided_slice %118 {offsets = [0, 32], sizes = [8, 16], strides = [1, 1]} : vector<8x64xf32> to vector<8x16xf32>
      %132 = vector.extract_strided_slice %118 {offsets = [0, 48], sizes = [8, 16], strides = [1, 1]} : vector<8x64xf32> to vector<8x16xf32>
      %133 = arith.mulf %124, %132 : vector<8x16xf32>
      %134 = arith.addf %131, %133 : vector<8x16xf32>
      %135 = math.tanh %134 : vector<8x16xf32>
      %cst_36 = arith.constant 1.000000e+00 : f32
      %136 = vector.broadcast %cst_36 : f32 to vector<8x16xf32>
      %137 = arith.subf %136, %130 : vector<8x16xf32>
      %138 = arith.mulf %137, %135 : vector<8x16xf32>
      %139 = arith.mulf %130, %arg12 : vector<8x16xf32>
      %140 = arith.addf %138, %139 : vector<8x16xf32>
      %c16 = arith.constant 16 : index
      %c0_37 = arith.constant 0 : index
      %141 = vector.load %arg2[%c16, %c0_37] : memref<248x64xf32, #tpu.memory_space<vmem>>, vector<16x4xf32>
      %cst_38 = arith.constant dense<0.000000e+00> : vector<8x4xf32>
      %142 = tpu.matmul %140, %141, %cst_38 {dimension_numbers = #tpu.dot_dimension_numbers<[1], [0], [0], [1], [0, 0, 1, 1], [], []>} : vector<8x16xf32>, vector<16x4xf32>, vector<8x4xf32> -> vector<8x4xf32>
      %143 = vector.broadcast %3 : vector<1x4xf32> to vector<8x4xf32>
      %144 = arith.addf %142, %143 : vector<8x4xf32>
      %cst_39 = arith.constant 0.000000e+00 : f32
      %145 = vector.broadcast %cst_39 : f32 to vector<8x4xf32>
      %146 = arith.maximumf %144, %145 : vector<8x4xf32>
      %147 = tpu.concatenate %146, %76 in 1 : vector<8x4xf32>, vector<8x8xf32> -> vector<8x12xf32>
      %148 = tpu.concatenate %147, %arg13 in 1 : vector<8x12xf32>, vector<8x4xf32> -> vector<8x16xf32>
      %c208 = arith.constant 208 : index
      %c0_40 = arith.constant 0 : index
      %149 = vector.load %arg2[%c208, %c0_40] : memref<248x64xf32, #tpu.memory_space<vmem>>, vector<16x16xf32>
      %cst_41 = arith.constant dense<0.000000e+00> : vector<8x16xf32>
      %150 = tpu.matmul %148, %149, %cst_41 {dimension_numbers = #tpu.dot_dimension_numbers<[1], [0], [0], [1], [0, 0, 1, 1], [], []>} : vector<8x16xf32>, vector<16x16xf32>, vector<8x16xf32> -> vector<8x16xf32>
      %151 = vector.broadcast %10 : vector<1x16xf32> to vector<8x16xf32>
      %152 = arith.addf %150, %151 : vector<8x16xf32>
      %153 = vector.extract_strided_slice %152 {offsets = [0, 0], sizes = [8, 4], strides = [1, 1]} : vector<8x16xf32> to vector<8x4xf32>
      %154 = arith.negf %153 : vector<8x4xf32>
      %155 = math.exp %154 : vector<8x4xf32>
      %cst_42 = arith.constant 1.000000e+00 : f32
      %156 = vector.broadcast %cst_42 : f32 to vector<8x4xf32>
      %157 = arith.addf %156, %155 : vector<8x4xf32>
      %158 = arith.divf %156, %157 : vector<8x4xf32>
      %159 = vector.extract_strided_slice %152 {offsets = [0, 4], sizes = [8, 4], strides = [1, 1]} : vector<8x16xf32> to vector<8x4xf32>
      %160 = arith.negf %159 : vector<8x4xf32>
      %161 = math.exp %160 : vector<8x4xf32>
      %cst_43 = arith.constant 1.000000e+00 : f32
      %162 = vector.broadcast %cst_43 : f32 to vector<8x4xf32>
      %163 = arith.addf %162, %161 : vector<8x4xf32>
      %164 = arith.divf %162, %163 : vector<8x4xf32>
      %165 = vector.extract_strided_slice %152 {offsets = [0, 8], sizes = [8, 4], strides = [1, 1]} : vector<8x16xf32> to vector<8x4xf32>
      %166 = vector.extract_strided_slice %152 {offsets = [0, 12], sizes = [8, 4], strides = [1, 1]} : vector<8x16xf32> to vector<8x4xf32>
      %167 = arith.mulf %158, %166 : vector<8x4xf32>
      %168 = arith.addf %165, %167 : vector<8x4xf32>
      %169 = math.tanh %168 : vector<8x4xf32>
      %cst_44 = arith.constant 1.000000e+00 : f32
      %170 = vector.broadcast %cst_44 : f32 to vector<8x4xf32>
      %171 = arith.subf %170, %164 : vector<8x4xf32>
      %172 = arith.mulf %171, %169 : vector<8x4xf32>
      %173 = arith.mulf %164, %arg13 : vector<8x4xf32>
      %174 = arith.addf %172, %173 : vector<8x4xf32>
      %175 = tpu.concatenate %140, %174 in 1 : vector<8x16xf32>, vector<8x4xf32> -> vector<8x20xf32>
      %c32 = arith.constant 32 : index
      %c0_45 = arith.constant 0 : index
      %176 = vector.load %arg2[%c32, %c0_45] : memref<248x64xf32, #tpu.memory_space<vmem>>, vector<20x40xf32>
      %cst_46 = arith.constant dense<0.000000e+00> : vector<8x40xf32>
      %177 = tpu.matmul %175, %176, %cst_46 {dimension_numbers = #tpu.dot_dimension_numbers<[1], [0], [0], [1], [0, 0, 1, 1], [], []>} : vector<8x20xf32>, vector<20x40xf32>, vector<8x40xf32> -> vector<8x40xf32>
      %178 = vector.broadcast %4 : vector<1x40xf32> to vector<8x40xf32>
      %179 = arith.addf %177, %178 : vector<8x40xf32>
      %cst_47 = arith.constant 0.000000e+00 : f32
      %180 = vector.broadcast %cst_47 : f32 to vector<8x40xf32>
      %181 = arith.maximumf %179, %180 : vector<8x40xf32>
      %c56 = arith.constant 56 : index
      %c0_48 = arith.constant 0 : index
      %182 = vector.load %arg2[%c56, %c0_48] : memref<248x64xf32, #tpu.memory_space<vmem>>, vector<40x8xf32>
      %cst_49 = arith.constant dense<0.000000e+00> : vector<8x8xf32>
      %183 = tpu.matmul %181, %182, %cst_49 {dimension_numbers = #tpu.dot_dimension_numbers<[1], [0], [0], [1], [0, 0, 1, 1], [], []>} : vector<8x40xf32>, vector<40x8xf32>, vector<8x8xf32> -> vector<8x8xf32>
      %184 = vector.broadcast %5 : vector<1x8xf32> to vector<8x8xf32>
      %185 = arith.addf %183, %184 : vector<8x8xf32>
      %186 = tpu.concatenate %174, %185 in 1 : vector<8x4xf32>, vector<8x8xf32> -> vector<8x12xf32>
      %c96 = arith.constant 96 : index
      %c0_50 = arith.constant 0 : index
      %187 = vector.load %arg2[%c96, %c0_50] : memref<248x64xf32, #tpu.memory_space<vmem>>, vector<12x16xf32>
      %cst_51 = arith.constant dense<0.000000e+00> : vector<8x16xf32>
      %188 = tpu.matmul %186, %187, %cst_51 {dimension_numbers = #tpu.dot_dimension_numbers<[1], [0], [0], [1], [0, 0, 1, 1], [], []>} : vector<8x12xf32>, vector<12x16xf32>, vector<8x16xf32> -> vector<8x16xf32>
      %189 = vector.broadcast %6 : vector<1x16xf32> to vector<8x16xf32>
      %190 = arith.addf %188, %189 : vector<8x16xf32>
      %cst_52 = arith.constant 0.000000e+00 : f32
      %191 = vector.broadcast %cst_52 : f32 to vector<8x16xf32>
      %192 = arith.maximumf %190, %191 : vector<8x16xf32>
      %193 = tpu.concatenate %140, %192 in 1 : vector<8x16xf32>, vector<8x16xf32> -> vector<8x32xf32>
      %c112 = arith.constant 112 : index
      %c0_53 = arith.constant 0 : index
      %194 = vector.load %arg2[%c112, %c0_53] : memref<248x64xf32, #tpu.memory_space<vmem>>, vector<32x16xf32>
      %cst_54 = arith.constant dense<0.000000e+00> : vector<8x16xf32>
      %195 = tpu.matmul %193, %194, %cst_54 {dimension_numbers = #tpu.dot_dimension_numbers<[1], [0], [0], [1], [0, 0, 1, 1], [], []>} : vector<8x32xf32>, vector<32x16xf32>, vector<8x16xf32> -> vector<8x16xf32>
      %196 = vector.broadcast %7 : vector<1x16xf32> to vector<8x16xf32>
      %197 = arith.addf %195, %196 : vector<8x16xf32>
      %cst_55 = arith.constant 0.000000e+00 : f32
      %198 = vector.broadcast %cst_55 : f32 to vector<8x16xf32>
      %199 = arith.maximumf %197, %198 : vector<8x16xf32>
      %200 = arith.subf %25, %33 : vector<8x2xf32>
      %201 = tpu.concatenate %200, %200, %200, %200 in 1 : vector<8x2xf32>, vector<8x2xf32>, vector<8x2xf32>, vector<8x2xf32> -> vector<8x8xf32>
      %202 = arith.mulf %185, %201 : vector<8x8xf32>
      %c240 = arith.constant 240 : index
      %c0_56 = arith.constant 0 : index
      %203 = vector.load %arg2[%c240, %c0_56] : memref<248x64xf32, #tpu.memory_space<vmem>>, vector<8x4xf32>
      %cst_57 = arith.constant dense<0.000000e+00> : vector<8x4xf32>
      %204 = tpu.matmul %202, %203, %cst_57 {dimension_numbers = #tpu.dot_dimension_numbers<[1], [0], [0], [1], [0, 0, 1, 1], [], []>} : vector<8x8xf32>, vector<8x4xf32>, vector<8x4xf32> -> vector<8x4xf32>
      %205 = arith.addf %31, %204 : vector<8x4xf32>
      %206 = tpu.concatenate %205, %185 in 1 : vector<8x4xf32>, vector<8x8xf32> -> vector<8x12xf32>
      %207 = arith.index_cast %arg6 : i32 to index
      %c0_58 = arith.constant 0 : index
      %c0_59 = arith.constant 0 : index
      %208 = vector.load %arg4[%207, %c0_58, %c0_59] : memref<16x8x12xf32, #tpu.memory_space<vmem>>, vector<1x8x12xf32>
      %209 = vector.shape_cast %208 : vector<1x8x12xf32> to vector<8x12xf32>
      %210 = vector.shape_cast %206 : vector<8x12xf32> to vector<1x8x12xf32>
      tpu.vector_store %arg4[%207, %c0_58, %c0_59], %210 {strides = array<i32>} : memref<16x8x12xf32, #tpu.memory_space<vmem>>, vector<1x8x12xf32>,
      scf.yield %205, %arg7, %31, %25, %112, %199, %174 : vector<8x4xf32>, vector<8x4xf32>, vector<8x4xf32>, vector<8x2xf32>, vector<8x16xf32>, vector<8x16xf32>, vector<8x4xf32>
    }
    %c16_i32_3 = arith.constant 16 : i32
    %21 = tpu.concatenate %20#0, %20#1, %20#2, %20#3, %20#4, %20#5, %20#6 in 1 : vector<8x4xf32>, vector<8x4xf32>, vector<8x4xf32>, vector<8x2xf32>, vector<8x16xf32>, vector<8x16xf32>, vector<8x4xf32> -> vector<8x50xf32>
    %c0_4 = arith.constant 0 : index
    %c0_5 = arith.constant 0 : index
    %22 = vector.load %arg5[%c0_4, %c0_5] : memref<8x50xf32, #tpu.memory_space<vmem>>, vector<8x50xf32>
    tpu.vector_store %arg5[%c0_4, %c0_5], %21 {strides = array<i32>} : memref<8x50xf32, #tpu.memory_space<vmem>>, vector<8x50xf32>,
    return
  }
}

</mosaic_0001>

<bundles_post_ra>
// kernel: tpu_custom_call.1
= control target key start
LH: loop header
LB: loop body
LE: loop exit
PB: predicated region body
PF: predicated region fallthrough
CT: control target
= control target key end

     0   :  { %s2192_s0 = inlined_call_operand.vmem [shape: f32[16,8,2], index: 0, kind: input, shape index: {}]   ;;  %s2193_s1 = inlined_call_operand.vmem [shape: f32[8,50], index: 1, kind: input, shape index: {}]   ;;  %s2194_s2 = inlined_call_operand.vmem [shape: f32[248,64], index: 2, kind: input, shape index: {}]   ;;  %s2195_s3 = inlined_call_operand.vmem [shape: f32[10,64], index: 3, kind: input, shape index: {}]   ;;  %s2196_s4 = inlined_call_operand.vmem [shape: f32[16,8,12], index: 4, kind: output, shape index: {0}]   ;;  %s2197_s5 = inlined_call_operand.hbm [shape: f32[8,50], index: 5, kind: output, shape index: {1}]  }
   0x1   :  { %v22_v0 = vld [vmem:[%s2193_s1] sm:$0xff]  }
   0x2   :  { %11 = vsyncpa [#allocation3], 0  ;;  %v1828_v1 = vld [vmem:[%s2195_s3] sm:$0xff]  ;;  %s1765_s22 = smov 116   ;;  %s1766_s23 = smov 124  }
   0x3   :  { %30 = vrot.lane.b32.xlu1 %v22_v0, %s1765_s22  ;;  %24 = vrot.lane.b32.xlu0 %v22_v0, %s1766_s23  ;;  %v1833_v2 = vld [vmem:[%s2195_s3 + $0x8] sm:$0x3]  ;;  %s1767_s26 = smov 114   ;;  %s1768_s27 = smov 120  }
   0x4   :  { %s1769_s1 = smov 82   ;;  %s1770_s28 = smov 98  }
   0x5   :  { %s1849_s3 = smov 0  }
   0x7   :  { %33 = vrot.lane.b32.xlu1 %v22_v0, %s1767_s26  ;;  %27 = vrot.lane.b32.xlu0 %v22_v0, %s1768_s27 }
   0xb   :  { %39 = vrot.lane.b32.xlu1 %v22_v0, %s1769_s1  ;;  %36 = vrot.lane.b32.xlu0 %v22_v0, %s1770_s28 }
  0x75   :  { %v31_v3 = vpop.permute.xlu1 %30   ;;  %v25_v4 = vpop.permute.xlu0 %24  }
  0x79   :  { %v34_v5 = vpop.permute.xlu1 %33   ;;  %v28_v6 = vpop.permute.xlu0 %27  }
  0x7d   :  { %v40_v7 = vpop.permute.xlu1 %39   ;;  %v37_v8 = vpop.permute.xlu0 %36  }
  0x7e LB: > { %v2198_v9 = vmov %v1759_v0  ;;  %v58_v10 = vld [vmem:[%s2194_s2 + $0xe0] sm:$0xf]  ;;  %vm63_vm0 = vcmask 1043456   ;;  %v1771_v11 = vmov 0.0   ;;  %vm1772_vm1 = vmmov 0   ;;  %s1773_s8 = smov 4   ;;  %s1763_s3 = sphi %s1849_s3, %s47_s3   ;;  %v1759_v0 = vphi %v22_v0, %v2208_v0   ;;  %v1755_v4 = vphi %v25_v4, %v2207_v4   ;;  %v1751_v6 = vphi %v28_v6, %v2206_v6   ;;  %v1747_v3 = vphi %v31_v3, %v2205_v3   ;;  %v1743_v5 = vphi %v34_v5, %v2204_v5   ;;  %v1739_v8 = vphi %v37_v8, %v2203_v8   ;;  %v1735_v7 = vphi %v40_v7, %v2202_v7  }
  0x7f   : > { %1459 = vmatprep.subr.mxu0 %v1771_v11  ;;  %1461 = vmatprep.mubr.msk.f32.mxu0 %vm1772_vm1, %v1771_v11  ;;  %vm59_vm2 = vcmask 31744   ;;  %v140_v12 = vld [vmem:[%s2194_s2 + $0xe8] sm:$0xf]  ;;  %v242_v13 = vsub.f32 %v2198_v9, %v1751_v6  ;;  %v234_v16 = vsub.f32 %v2198_v9, %v1755_v4  ;;  %s1393_s9 = sshll.u32 %s1763_s3, 3  ;;  %v342_v30 = vld [vmem:[%s2194_s2] sm:$0xff]  ;;  %vm219_vm3 = vcmask 15360  }
  0x80   : > { %1460 = vmatpush3.msk.msra.mxu0 %vm63_vm0, %v58_v10  ;;  %1464 = vmatprep.subr.mxu1 %v1771_v11  ;;  %s56_s12 = scalar_lea.vmem %s2192_s0, %s1393_s9  ;;  %vm347_vm4 = vcmask 64512   ;;  %v255_v44 = vld [vmem:[%s2194_s2 + $0x8] sm:$0xf]  ;;  %s1774_s17 = smov 2   ;;  %v256_v52 = vlaneseq  ;;  %v429_v61 = vld [vmem:[%s2194_s2 + $0xa0] sm:$0xff]  ;;  %v428_v0 = vld [vmem:[%s2194_s2 + $0x98] sm:$0xff] }
  0x81   : > { %1462 = vmatmul.mubr.msk.f32.vlgmr.msra.gmra.mxu0 %vm59_vm2, %v2198_v9  ;;  %1466 = vmatprep.mubr.msk.f32.mxu1 %vm1772_vm1, %v1771_v11  ;;  %v243_v14 = vmul.f32 %v242_v13, %v242_v13  ;;  %v235_v17 = vmul.f32 %v234_v16, %v234_v16  ;;  %v1907_v28 = vld [vmem:[%s56_s12] sm:$0xff]   ;;  %s1775_s18 = smov 8   ;;  %v427_v4 = vld [vmem:[%s2194_s2 + $0x90] sm:$0xff]  ;;  %vm434_vm5 = vcmask 195584   ;;  %s1776_s25 = smov 80   ;;  %vm544_vm6 = vcmask 130048  }
  0x82   : > { %1469 = vmatprep.subr.mxu0 %v1771_v11  ;;  %1471 = vmatprep.mubr.msk.f32.mxu0 %vm1772_vm1, %v1771_v11  ;;  %v217_v29 = vsub.f32 %v1907_v28, %v1747_v3  ;;  %v1934_v53 = vshrl.u32 %v256_v52, 7  ;;  %s1777_s26 = smov 32   ;;  %s1778_s28 = smov 112   ;;  %vm560_vm7 = vcmask 326656   ;;  %vm753_vm8 = vcmask 97280  }
  0x83   : > { %1465 = vmatpush3.msk.msra.mxu1 %vm63_vm0, %v140_v12  ;;  %v244_v15 = vsel %vm59_vm2, %v243_v14, 0.0  ;;  %v236_v18 = vsel %vm59_vm2, %v235_v17, 0.0  ;;  %1470 = vmatpush3.msk.msra.mxu0 %vm63_vm0, %v255_v44  ;;  %s1779_s29 = smov 24   ;;  %s1780_s7 = smov 16   ;;  %vm875_vm9 = vcmask 162816   ;;  %vm1226_vm10 = vcmask 48128  }
  0x84   : > { %1474 = vmatprep.subr.mxu1 %v1771_v11  ;;  %245 = vadd.xlane.f32.xlu0 %v244_v15  ;;  %v218_v31 = vmul.f32 %v217_v29, %v217_v29  ;;  %v345_v54 = vsub.s32 0, %v1934_v53  ;;  %v432_v10 = vsub.s32 7, %v1934_v53  ;;  %v258_v52 = vsub.s32 1, %v1934_v53  ;;  %s1781_s22 = smov 12   ;;  %s1782_s27 = smov 116  }
  0x85   : > { %1479 = vmatprep.subr.mxu0 %v1771_v11  ;;  %s1783_s6 = smov 124   ;;  %s1784_s15 = smov 6   ;;  %vm1139_vm11 = vcmask 261120  }
  0x86   : > { %v220_v32 = vsel %vm219_vm3, %v218_v31, 0.0  ;;  %v346_v57 = vrot.slane %v1828_v1, %v345_v54  ;;  %v433_v14 = vrot.slane %v1828_v1, %v432_v10  ;;  %v553_v31 = vld [vmem:[%s2194_s2 + $0xb8] sm:$0xff]  ;;  %s1305_s14 = scalar_lea.vmem %s2196_s4, %s1393_s9  ;;  %s47_s3 = sadd.s32 1, %s1763_s3  }
  0x87   : > { %p44_p0 = scmp.ge.s32.totalorder %s47_s3, 16  }
  0x88   : > { %237 = vadd.xlane.f32.xlu0 %v236_v18  ;;  %s1785_s9 = smov (%p44_p0), 4   ;;  %s1788_s16 = smov (%p44_p0), 14   ;;  %vm1337_vm12 = vcmask (%p44_p0), 113664   ;;  %vm1339_vm13 = vcmask (%p44_p0), 244736   ;;  %vm1341_vm14 = vcmask (%p44_p0), 375808   ;;  %vm1343_vm15 = vcmask (%p44_p0), 408576  }
  0x89   :  { %s1789_s19 = smov (%p44_p0), 30   ;;  %s1791_s0 = smov (%p44_p0), [#allocation2]  }
  0x8c   : > { %221 = vadd.xlane.f32.xlu0 %v220_v32  ;;  %v552_v32 = vld [vmem:[%s2194_s2 + $0xb0] sm:$0xff] }
 0x10d   : > { %v246_v24 = vpop.xlane.xlu0 %245 }
 0x111   : > { %v238_v33 = vpop.xlane.xlu0 %237 }
 0x115   : > { %v222_v51 = vpop.xlane.xlu0 %221 }
 0x141   : > { %v133_v19 = vpop.f32.mrf.mxu0 }
 0x142   : > { %1651 = vtanh.f32 %v133_v19 }
 0x143   : > { %v1463_v20 = vpop.f32.mrf.mxu0  ;;  %1653 = vrsqrt.f32 %v246_v24 }
 0x144   : > { %1655 = vrsqrt.f32 %v238_v33 }
 0x14f   : > { %v1652_v21 = vpop.eup %1651 }
 0x150   : > { %v138_v22 = vmul.f32 0.1, %v1652_v21  ;;  %v1654_v25 = vpop.eup %1653 }
 0x151   : > { %v248_v26 = vmin.f32 %v1654_v25, 1e+12  ;;  %v1656_v34 = vpop.eup %1655 }
 0x152   : > { %v1894_v6 = vadd.f32 %v2198_v9, %v138_v22   ;;  %v240_v35 = vmin.f32 %v1656_v34, 1e+12 }
 0x153   : > { %v249_v27 = vmul.f32 %v248_v26, %v242_v13 }
 0x154   : > { %v2199_v23 = vmov %v1894_v6  ;;  %v241_v36 = vmul.f32 %v240_v35, %v234_v16 }
 0x155   : > { %1467 = vmatmul.mubr.msk.f32.vlgmr.msra.gmra.mxu1 %vm59_vm2, %v2199_v23  ;;  %338 = vrot.lane.b32.xlu1 %v249_v27, %s1773_s8 }
 0x156   : > { %1476 = vmatprep.mubr.msk.f32.mxu1 %vm1772_vm1, %v1771_v11  ;;  %1475 = vmatpush3.msra.mxu1 %v342_v30  ;;  %v554_v30 = vld [vmem:[%s2194_s2 + $0xc0] sm:$0xff] }
 0x157   : > { %1488 = vmatprep.subr.mxu1 %v1771_v11 }
 0x1c7   : > { %v339_v37 = vpop.permute.xlu1 %338 }
 0x1c8   : > { %v341_v38 = vsel %vm59_vm2, %v241_v36, %v339_v37 }
 0x1c9   : > { %1477 = vmatmul.mubr.msk.f32.vlgmr.msra.gmra.mxu1 %vm347_vm4, %v341_v38 }
 0x1ca   : > { %1498 = vmatprep.mubr.msk.f32.mxu1 %vm1772_vm1, %v1771_v11 }
 0x215   : > { %v213_v39 = vpop.f32.mrf.mxu1 }
 0x216   : > { %v1920_v40 = vsub.f32 %v1907_v28, %v213_v39 }
 0x217   : > { %v1468_v41 = vpop.f32.mrf.mxu1 }
 0x218   : > { %v227_v42 = vmul.f32 %v1920_v40, %v1920_v40 }
 0x21a   : > { %v228_v43 = vsel %vm219_vm3, %v227_v42, 0.0 }
 0x21b   : > { %229 = vadd.xlane.f32.xlu1 %v228_v43 }
 0x289   : > { %v417_v46 = vpop.f32.mrf.mxu1 }
 0x28a   : > { %v1940_v59 = vadd.f32 %v417_v46, %v346_v57  ;;  %v259_v57 = vrot.slane %v1828_v1, %v258_v52 }
 0x28b   : > { %v1478_v47 = vpop.f32.mrf.mxu1 }
 0x28c   : > { %v421_v62 = vmax.f32 %v1940_v59, 0.0 }
 0x2a4   : > { %v230_v45 = vpop.xlane.xlu1 %229 }
 0x2a5   : > { %1657 = vrsqrt.f32 %v230_v45  ;;  %v559_v45 = vrot.slane %v1833_v2, %v345_v54 }
 0x2a6   : > { %1659 = vrsqrt.f32 %v222_v51 }
 0x2b2   : > { %v1658_v48 = vpop.eup %1657 }
 0x2b3   : > { %v232_v49 = vmin.f32 %v1658_v48, 1e+12  ;;  %v1660_v55 = vpop.eup %1659 }
 0x2b4   : > { %v224_v56 = vmin.f32 %v1660_v55, 1e+12 }
 0x2b5   : > { %v233_v50 = vmul.f32 %v232_v49, %v1920_v40 }
 0x2b6   : > { %v225_v58 = vmul.f32 %v224_v56, %v217_v29  ;;  %v555_v29 = vld [vmem:[%s2194_s2 + $0xc8] sm:$0xff] }
 0x2b7   : > { %251 = vrot.lane.b32.xlu0 %v233_v50, %s1774_s17  ;;  %1489 = vmatpush3.msra.mxu1 %v555_v29 }
 0x2b8   : > { %1490 = vmatprep.subr.mxu1 %v1771_v11 }
 0x2b9   : > { %1491 = vmatpush3.msra.mxu1 %v554_v30 }
 0x2ba   : > { %1492 = vmatprep.subr.mxu1 %v1771_v11 }
 0x2bb   : > { %423 = vrot.lane.b32.xlu0 %v1743_v5, %s1775_s18  ;;  %1493 = vmatpush3.msra.mxu1 %v553_v31 }
 0x2bc   : > { %1494 = vmatprep.subr.mxu1 %v1771_v11 }
 0x2bd   : > { %1495 = vmatpush3.msra.mxu1 %v552_v32 }
 0x2be   : > { %1496 = vmatprep.subr.mxu1 %v1771_v11 }
 0x329   : > { %v252_v60 = vpop.permute.xlu0 %251 }
 0x32a   : > { %v254_v63 = vsel %vm219_vm3, %v225_v58, %v252_v60 }
 0x32b   : > { %1472 = vmatmul.mubr.msk.f32.vlgmr.msra.gmra.mxu0 %vm59_vm2, %v254_v63  ;;  %v662_v63 = vld [vmem:[%s2194_s2 + $0x10] sm:$0xff] }
 0x32c   : > { %1480 = vmatpush3.msra.mxu0 %v429_v61  ;;  %1485 = vmatprep.mubr.msk.f32.mxu0 %vm1772_vm1, %v1771_v11 }
 0x32d   : > { %1481 = vmatprep.subr.mxu0 %v1771_v11  ;;  %v424_v3 = vpop.permute.xlu0 %423 }
 0x32e   : > { %1482 = vmatpush3.msra.mxu0 %v428_v0  ;;  %v426_v6 = vsel %vm347_vm4, %v421_v62, %v424_v3 }
 0x32f   : > { %1483 = vmatprep.subr.mxu0 %v1771_v11 }
 0x330   : > { %1484 = vmatpush3.msra.mxu0 %v427_v4 }
 0x331   : > { %1486 = vmatmul.mubr.msk.f32.vlgmr.msra.gmra.mxu0 %vm434_vm5, %v426_v6  ;;  %1501 = vmatprep.subr.mxu0 %v1771_v11 }
 0x332   : > { %1505 = vmatprep.mubr.msk.f32.mxu0 %vm1772_vm1, %v1771_v11 }
 0x3eb   : > { %v1966_v12 = vpop.f32.mrf.mxu0 }
 0x3ec   : > { %v333_v54 = vadd.f32 %v1966_v12, %v259_v57  ;;  %v954_v57 = vld [vmem:[%s2194_s2 + $0x40] sm:$0xff] }
 0x3ed   : > { %v1473_v13 = vpop.f32.mrf.mxu0 }
 0x3ee   : > { %v336_v59 = vmax.f32 %v333_v54, 0.0  ;;  %v873_v54 = vsub.s32 3, %v1934_v53 }
 0x3f1   : > { %v504_v15 = vpop.f32.mrf.mxu0 }
 0x3f2   : > { %v505_v16 = vadd.f32 %v504_v15, %v433_v14  ;;  %v756_v14 = vld [vmem:[%s2194_s2 + $0xd8] sm:$0xff]  ;;  %v755_v15 = vld [vmem:[%s2194_s2 + $0xd0] sm:$0xff] }
 0x3f3   : > { %v1487_v17 = vpop.f32.mrf.mxu0 }
 0x3f4   : > { %515 = vrot.lane.b32.xlu0 %v505_v16, %s1776_s25  ;;  %v1402_v18 = vmul.f32 -1.442695, %v505_v16 }
 0x3f6   : > { %1661 = vpow2.f32 %v1402_v18 }
 0x403   : > { %v1662_v19 = vpop.eup %1661 }
 0x404   : > { %v511_v20 = vadd.f32 1.0, %v1662_v19 }
 0x406   : > { %1663 = vrcp.f32 %v511_v20 }
 0x413   : > { %v1664_v21 = vpop.eup %1663 }
 0x414   : > { %v525_v34 = vsub.f32 1.0, %v1664_v21 }
 0x466   : > { %v516_v22 = vpop.permute.xlu0 %515 }
 0x467   : > { %v518_v24 = vmul.f32 %v1664_v21, %v516_v22 }
 0x469   : > { %520 = vrot.lane.b32.xlu1 %v518_v24, %s1777_s26 }
 0x46d   : > { %547 = vrot.lane.b32.xlu1 %v1739_v8, %s1779_s29 }
 0x4db   : > { %v521_v25 = vpop.permute.xlu1 %520 }
 0x4dc   : > { %v523_v26 = vadd.f32 %v521_v25, %v505_v16  ;;  %v666_v16 = vsub.s32 2, %v1934_v53 }
 0x4de   : > { %1665 = vtanh.f32 %v523_v26  ;;  %v667_v17 = vrot.slane %v1828_v1, %v666_v16 }
 0x4df   : > { %v548_v41 = vpop.permute.xlu1 %547 }
 0x4eb   : > { %v1666_v27 = vpop.eup %1665 }
 0x4ec   : > { %527 = vrot.lane.b32.xlu0 %v1666_v27, %s1778_s28  ;;  %v760_v27 = vrot.slane %v1833_v2, %v258_v52 }
 0x4f0   : > { %531 = vrot.lane.b32.xlu0 %v1743_v5, %s1780_s7  ;;  %v551_v5 = vld [vmem:[%s2194_s2 + $0xa8] sm:$0xff] }
 0x4f1   : > { %1497 = vmatpush3.msra.mxu1 %v551_v5 }
 0x4f2   : > { %1515 = vmatprep.subr.mxu1 %v1771_v11 }
 0x55e   : > { %v528_v33 = vpop.permute.xlu0 %527 }
 0x55f   : > { %v530_v36 = vmul.f32 %v528_v33, %v525_v34 }
 0x562   : > { %v532_v35 = vpop.permute.xlu0 %531 }
 0x563   : > { %v534_v37 = vmul.f32 %v1664_v21, %v532_v35 }
 0x565   : > { %v535_v38 = vadd.f32 %v534_v37, %v530_v36 }
 0x567   : > { %537 = vrot.lane.b32.xlu0 %v535_v38, %s1778_s28 }
 0x56b   : > { %541 = vrot.lane.b32.xlu0 %v421_v62, %s1775_s18  ;;  %v663_v62 = vld [vmem:[%s2194_s2 + $0x18] sm:$0xff] }
 0x56c   : > { %1502 = vmatpush3.msra.mxu0 %v663_v62 }
 0x56d   : > { %1503 = vmatprep.subr.mxu0 %v1771_v11 }
 0x56e   : > { %1504 = vmatpush3.msra.mxu0 %v662_v63 }
 0x56f   : > { %1508 = vmatprep.subr.mxu0 %v1771_v11 }
 0x5d9   : > { %v1999_v5 = vpop.permute.xlu0 %537  }
 0x5da   : > { %v2200_v39 = vmov %v1999_v5 }
 0x5dd   : > { %v542_v42 = vpop.permute.xlu0 %541 }
 0x5de   : > { %v545_v43 = vsel %vm544_vm6, %v2200_v39, %v542_v42  ;;  %v870_v42 = vld [vmem:[%s2194_s2 + $0x30] sm:$0xf] }
 0x5df   : > { %v550_v44 = vsel %vm434_vm5, %v545_v43, %v548_v41  ;;  %v869_v43 = vld [vmem:[%s2194_s2 + $0x28] sm:$0xff] }
 0x5e0   : > { %1499 = vmatmul.mubr.msk.f32.vlgmr.msra.gmra.mxu1 %vm560_vm7, %v550_v44 }
 0x5e1   : > { %1521 = vmatprep.mubr.msk.f32.mxu1 %vm1772_vm1, %v1771_v11  ;;  %1516 = vmatpush3.msk.msra.mxu1 %vm63_vm0, %v870_v42  ;;  %v1137_v42 = vsub.s32 6, %v1934_v53 }
 0x5e2   : > { %1517 = vmatprep.subr.mxu1 %v1771_v11 }
 0x5e3   : > { %1518 = vmatpush3.msra.mxu1 %v869_v43  ;;  %v1138_v43 = vrot.slane %v1828_v1, %v1137_v42 }
 0x5e4   : > { %1519 = vmatprep.subr.mxu1 %v1771_v11 }
 0x6a0   : > { %v630_v46 = vpop.f32.mrf.mxu1 }
 0x6a1   : > { %v631_v47 = vadd.f32 %v630_v46, %v559_v45  ;;  %v957_v46 = vld [vmem:[%s2194_s2 + $0x58] sm:$0xff] }
 0x6a2   : > { %v1500_v48 = vpop.f32.mrf.mxu1 }
 0x6a3   : > { %641 = vrot.lane.b32.xlu0 %v631_v47, %s1776_s25  ;;  %v1404_v49 = vmul.f32 -1.442695, %v631_v47 }
 0x6a5   : > { %1667 = vpow2.f32 %v1404_v49 }
 0x6b2   : > { %v1668_v50 = vpop.eup %1667 }
 0x6b3   : > { %v637_v51 = vadd.f32 1.0, %v1668_v50 }
 0x6b5   : > { %1669 = vrcp.f32 %v637_v51 }
 0x6c2   : > { %v1670_v55 = vpop.eup %1669 }
 0x6c3   : > { %v651_v3 = vsub.f32 1.0, %v1670_v55 }
 0x715   : > { %v642_v56 = vpop.permute.xlu0 %641 }
 0x716   : > { %v644_v58 = vmul.f32 %v1670_v55, %v642_v56  ;;  %v955_v56 = vld [vmem:[%s2194_s2 + $0x48] sm:$0xff] }
 0x718   : > { %646 = vrot.lane.b32.xlu1 %v644_v58, %s1777_s26  ;;  %v953_v58 = vld [vmem:[%s2194_s2 + $0x38] sm:$0xff] }
 0x71c   : > { %657 = vrot.lane.b32.xlu1 %v1739_v8, %s1780_s7 }
 0x720   : > { %745 = vrot.lane.b32.xlu1 %v336_v59, %s1773_s8  ;;  %v874_v59 = vrot.slane %v1828_v1, %v873_v54 }
 0x78a   : > { %v647_v60 = vpop.permute.xlu1 %646 }
 0x78b   : > { %v649_v61 = vadd.f32 %v647_v60, %v631_v47  ;;  %v956_v47 = vld [vmem:[%s2194_s2 + $0x50] sm:$0xff] }
 0x78d   : > { %1671 = vtanh.f32 %v649_v61 }
 0x78e   : > { %v658_v0 = vpop.permute.xlu1 %657 }
 0x78f   : > { %v660_v6 = vmul.f32 %v1670_v55, %v658_v0  ;;  %v1043_v0 = vld [vmem:[%s2194_s2 + $0x60] sm:$0xff] }
 0x792   : > { %v746_v24 = vpop.permute.xlu1 %745 }
 0x79a   : > { %v1672_v8 = vpop.eup %1671 }
 0x79b   : > { %653 = vrot.lane.b32.xlu0 %v1672_v8, %s1778_s28  ;;  %v1044_v8 = vld [vmem:[%s2194_s2 + $0x68] sm:$0xf] }
 0x80d   : > { %v654_v4 = vpop.permute.xlu0 %653 }
 0x80e   : > { %v656_v10 = vmul.f32 %v654_v4, %v651_v3  ;;  %v960_v3 = vsub.s32 4, %v1934_v53  ;;  %v1229_v4 = vld [vmem:[%s2194_s2 + $0xf0] sm:$0xff] }
 0x810   : > { %v661_v12 = vadd.f32 %v660_v6, %v656_v10  ;;  %v961_v6 = vrot.slane %v1828_v1, %v960_v3  ;;  %v2205_v3 = vmov %v1907_v28 }
 0x812   : > { %669 = vrot.lane.b32.xlu0 %v661_v12, %s1778_s28 }
 0x816   : > { %750 = vrot.lane.b32.xlu0 %v1735_v7, %s1781_s22 }
 0x884   : > { %v2030_v13 = vpop.permute.xlu0 %669 }
 0x885   : > { %1506 = vmatmul.mubr.msk.f32.vlgmr.msra.gmra.mxu0 %vm544_vm6, %v2030_v13 }
 0x886   : > { %1512 = vmatprep.mubr.msk.f32.mxu0 %vm1772_vm1, %v1771_v11  ;;  %1509 = vmatpush3.msra.mxu0 %v756_v14 }
 0x887   : > { %1510 = vmatprep.subr.mxu0 %v1771_v11 }
 0x888   : > { %1511 = vmatpush3.msra.mxu0 %v755_v15  ;;  %v751_v22 = vpop.permute.xlu0 %750 }
 0x889   : > { %1524 = vmatprep.subr.mxu0 %v1771_v11 }
 0x945   : > { %v739_v18 = vpop.f32.mrf.mxu0 }
 0x946   : > { %v740_v19 = vadd.f32 %v739_v18, %v667_v17 }
 0x947   : > { %v1507_v20 = vpop.f32.mrf.mxu0 }
 0x948   : > { %v743_v21 = vmax.f32 %v740_v19, 0.0 }
 0x94a   : > { %v748_v25 = vsel %vm59_vm2, %v743_v21, %v746_v24 }
 0x94b   : > { %v754_v26 = vsel %vm753_vm8, %v748_v25, %v751_v22 }
 0x94c   : > { %1513 = vmatmul.mubr.msk.f32.vlgmr.msra.gmra.mxu0 %vm544_vm6, %v754_v26  ;;  %v1134_v26 = vld [vmem:[%s2194_s2 + $0x88] sm:$0xff] }
 0x94d   : > { %1534 = vmatprep.mubr.msk.f32.mxu0 %vm1772_vm1, %v1771_v11  ;;  %1525 = vmatpush3.msra.mxu0 %v957_v46 }
 0x94e   : > { %1526 = vmatprep.subr.mxu0 %v1771_v11 }
 0x94f   : > { %1527 = vmatpush3.msra.mxu0 %v956_v47 }
 0x950   : > { %1528 = vmatprep.subr.mxu0 %v1771_v11 }
 0x951   : > { %1529 = vmatpush3.msra.mxu0 %v955_v56 }
 0x952   : > { %1530 = vmatprep.subr.mxu0 %v1771_v11 }
 0x953   : > { %1531 = vmatpush3.msra.mxu0 %v954_v57 }
 0x954   : > { %1532 = vmatprep.subr.mxu0 %v1771_v11 }
 0x955   : > { %1533 = vmatpush3.msra.mxu0 %v953_v58 }
 0x956   : > { %1555 = vmatprep.subr.mxu0 %v1771_v11 }
 0xa0c   : > { %v830_v29 = vpop.f32.mrf.mxu0 }
 0xa0d   : > { %v831_v30 = vadd.f32 %v830_v29, %v760_v27  ;;  %v1133_v27 = vld [vmem:[%s2194_s2 + $0x80] sm:$0xff]  ;;  %v1131_v29 = vld [vmem:[%s2194_s2 + $0x70] sm:$0xff] }
 0xa0e   : > { %v1514_v31 = vpop.f32.mrf.mxu0 }
 0xa0f   : > { %841 = vrot.lane.b32.xlu1 %v831_v30, %s1782_s27  ;;  %v1407_v32 = vmul.f32 -1.442695, %v831_v30 }
 0xa11   : > { %1673 = vpow2.f32 %v1407_v32 }
 0xa1e   : > { %v1674_v33 = vpop.eup %1673 }
 0xa1f   : > { %v837_v5 = vadd.f32 1.0, %v1674_v33 }
 0xa21   : > { %1675 = vrcp.f32 %v837_v5 }
 0xa2e   : > { %v1676_v34 = vpop.eup %1675 }
 0xa2f   : > { %v851_v45 = vsub.f32 1.0, %v1676_v34 }
 0xa81   : > { %v842_v35 = vpop.permute.xlu1 %841 }
 0xa82   : > { %v844_v36 = vmul.f32 %v1676_v34, %v842_v35 }
 0xa84   : > { %846 = vrot.lane.b32.xlu0 %v844_v36, %s1775_s18 }
 0xa88   : > { %857 = vrot.lane.b32.xlu0 %v1735_v7, %s1773_s8  ;;  %v868_v7 = vld [vmem:[%s2194_s2 + $0x20] sm:$0xff] }
 0xa89   : > { %1520 = vmatpush3.msra.mxu1 %v868_v7 }
 0xa8a   : > { %1537 = vmatprep.subr.mxu1 %v1771_v11 }
 0xaf6   : > { %v847_v37 = vpop.permute.xlu0 %846 }
 0xaf7   : > { %v849_v38 = vadd.f32 %v847_v37, %v831_v30  ;;  %v1047_v30 = vsub.s32 5, %v1934_v53 }
 0xaf9   : > { %1677 = vtanh.f32 %v849_v38  ;;  %v1048_v31 = vrot.slane %v1828_v1, %v1047_v30 }
 0xafa   : > { %v858_v44 = vpop.permute.xlu0 %857 }
 0xafb   : > { %v860_v49 = vmul.f32 %v1676_v34, %v858_v44 }
 0xb06   : > { %v1678_v41 = vpop.eup %1677 }
 0xb07   : > { %853 = vrot.lane.b32.xlu1 %v1678_v41, %s1783_s6 }
 0xb79   : > { %v854_v48 = vpop.permute.xlu1 %853 }
 0xb7a   : > { %v856_v50 = vmul.f32 %v854_v48, %v851_v45 }
 0xb7c   : > { %v861_v51 = vadd.f32 %v860_v49, %v856_v50 }
 0xb7e   : > { %1035 = vrot.lane.b32.xlu0 %v861_v51, %s1783_s6  ;;  %864 = vrot.lane.b32.xlu1 %v861_v51, %s1781_s22 }
 0xb82   : > { %1215 = vrot.lane.b32.xlu0 %v1920_v40, %s1774_s17  ;;  %s1790_s17 = smov (%p44_p0), 46  }
 0xb86   : > { %1221 = vrot.lane.b32.xlu0 %v1920_v40, %s1784_s15  ;;  %s1787_s15 = smov (%p44_p0), 8  }
 0xb8a   :  { %1308 = vrot.lane.b32.xlu0 (%p44_p0), %v2198_v9, %s1785_s9 }
 0xb8e   :  { %1312 = vrot.lane.b32.xlu0 (%p44_p0), %v2199_v23, %s1787_s15 }
 0xbf0   : > { %v865_v52 = vpop.permute.xlu1 %864  ;;  %v2118_v7 = vpop.permute.xlu0 %1035  }
 0xbf1   : > { %v867_v55 = vsel %vm544_vm6, %v2030_v13, %v865_v52  ;;  %v2201_v15 = vmov %v2118_v7 }
 0xbf2   : > { %1522 = vmatmul.mubr.msk.f32.vlgmr.msra.gmra.mxu1 %vm875_vm9, %v867_v55 }
 0xbf3   : > { %1541 = vmatprep.mubr.msk.f32.mxu1 %vm1772_vm1, %v1771_v11  ;;  %1538 = vmatpush3.msk.msra.mxu1 %vm63_vm0, %v1044_v8 }
 0xbf4   : > { %1539 = vmatprep.subr.mxu1 %v1771_v11  ;;  %v1216_v16 = vpop.permute.xlu0 %1215 }
 0xbf5   : > { %1540 = vmatpush3.msra.mxu1 %v1043_v0  ;;  %v1224_v19 = vsel %vm219_vm3, %v1920_v40, %v1216_v16 }
 0xbf6   : > { %1544 = vmatprep.subr.mxu1 %v1771_v11 }
 0xbf8   : > { %v1222_v21 = vpop.permute.xlu0 %1221 }
 0xbfc   :  { %v1309_v53 = vpop.permute.xlu0 (%p44_p0), %1308 }
 0xc00   :  { %v1313_v2 = vpop.permute.xlu0 (%p44_p0), %1312 }
 0xcb2   : > { %v948_v60 = vpop.f32.mrf.mxu1 }
 0xcb3   : > { %v949_v61 = vadd.f32 %v948_v60, %v874_v59 }
 0xcb4   : > { %v1523_v62 = vpop.f32.mrf.mxu1 }
 0xcb5   : > { %v952_v63 = vmax.f32 %v949_v61, 0.0 }
 0xcb7   : > { %1535 = vmatmul.mubr.msk.f32.vlgmr.msra.gmra.mxu0 %vm560_vm7, %v952_v63 }
 0xcb8   : > { %1557 = vmatprep.mubr.msk.f32.mxu0 %vm1772_vm1, %v1771_v11  ;;  %1556 = vmatpush3.msra.mxu0 %v1229_v4  ;;  %v2207_v4 = vmov %v2198_v9 }
 0xd77   : > { %v1031_v10 = vpop.f32.mrf.mxu0 }
 0xd78   : > { %v1032_v12 = vadd.f32 %v1031_v10, %v961_v6  ;;  %v2206_v6 = vmov %v2199_v23 }
 0xd79   : > { %v1536_v14 = vpop.f32.mrf.mxu0 }
 0xd7a   : > { %1039 = vrot.lane.b32.xlu1 %v1032_v12, %s1773_s8 }
 0xd7e   : > { %1218 = vrot.lane.b32.xlu1 %v1920_v40, %s1773_s8  ;;  %v1132_v40 = vld [vmem:[%s2194_s2 + $0x78] sm:$0xff]  ;;  %s1353_s2 = sshll.u32 (%p44_p0), %s1791_s0, 4  ;;  %s1354_s2 = int_to_ptr.vmem [resolvable:$true] %s1353_s2 }
 0xd7f   :  { %s1679_s4 = scalar_lea.vmem (%p44_p0), %s1354_s2, 128  ;;  %p1684_p2 = scmp.lt.s32.totalorder (%p44_p0), %s1354_s2, %s1354_s2 }
 0xd80   :  { %p1680_p1 = scmp.ne.s32.totalorder (%p44_p0), %s1354_s2, %s1679_s4  ;;  %p1685_p3 = scmp.lt.s32.totalorder (%p44_p0), %s1679_s4, %s1679_s4 }
 0xd82   :  { %p1686_p4 = por (%p44_p0), %p1685_p3, %p1684_p2 }
 0xd84   :  { %p1687_p5 = pnand (%p44_p0), %p1686_p4, %p1680_p1 }
 0xdec   : > { %v1040_v17 = vpop.permute.xlu1 %1039 }
 0xded   : > { %v1042_v18 = vsel %vm59_vm2, %v2201_v15, %v1040_v17 }
 0xdee   : > { %1542 = vmatmul.mubr.msk.f32.vlgmr.msra.gmra.mxu1 %vm753_vm8, %v1042_v18 }
 0xdef   : > { %1552 = vmatprep.mubr.msk.f32.mxu1 %vm1772_vm1, %v1771_v11  ;;  %1545 = vmatpush3.msra.mxu1 %v1134_v26 }
 0xdf0   : > { %v1219_v20 = vpop.permute.xlu1 %1218  ;;  %1546 = vmatprep.subr.mxu1 %v1771_v11 }
 0xdf1   : > { %v1225_v22 = vsel %vm59_vm2, %v1224_v19, %v1219_v20  ;;  %1547 = vmatpush3.msra.mxu1 %v1133_v27 }
 0xdf2   : > { %v1227_v24 = vsel %vm1226_vm10, %v1225_v22, %v1222_v21  ;;  %1548 = vmatprep.subr.mxu1 %v1771_v11 }
 0xdf3   : > { %v1228_v25 = vmul.f32 %v1227_v24, %v1032_v12  ;;  %1549 = vmatpush3.msra.mxu1 %v1132_v40 }
 0xdf4   : > { %1550 = vmatprep.subr.mxu1 %v1771_v11 }
 0xdf5   : > { %1558 = vmatmul.mubr.msk.f32.vlgmr.msra.gmra.mxu0 %vm347_vm4, %v1228_v25  ;;  %1551 = vmatpush3.msra.mxu1 %v1131_v29 }
 0xeae   : > { %v1121_v32 = vpop.f32.mrf.mxu1 }
 0xeaf   : > { %v1122_v33 = vadd.f32 %v1121_v32, %v1048_v31 }
 0xeb0   : > { %v1543_v5 = vpop.f32.mrf.mxu1 }
 0xeb1   : > { %v1125_v34 = vmax.f32 %v1122_v33, 0.0  ;;  %v2204_v5 = vmov %v2200_v39 }
 0xeb3   : > { %1127 = vrot.lane.b32.xlu1 %v1125_v34, %s1780_s7  ;;  %s1786_s7 = smov (%p44_p0), 12  }
 0xeb5   : > { %v1299_v35 = vpop.f32.mrf.mxu0 }
 0xeb6   : > { %v1303_v11 = vadd.f32 %v1299_v35, %v2199_v23  }
 0xeb7   : > { %v1559_v36 = vpop.f32.mrf.mxu0  ;;  %1316 = vrot.lane.b32.xlu1 (%p44_p0), %v1907_v28, %s1786_s7 }
 0xeb8   : > { %v1304_v37 = vsel %vm59_vm2, %v1303_v11, %v1040_v17  ;;  %v2208_v0 = vmov %v1303_v11  ;;  %v1332_v1 = vsel (%p44_p0), %vm59_vm2, %v1303_v11, %v1309_v53 }
 0xeb9   : > { %1306 = vst.msk [vmem:[%s1305_s14] sm:$0xff] %vm753_vm8, %v1304_v37  ;;  %v1334_v28 = vsel (%p44_p0), %vm347_vm4, %v1332_v1, %v1313_v2 }
 0xebb   :  { %1320 = vrot.lane.b32.xlu1 (%p44_p0), %v2200_v39, %s1788_s16 }
 0xebf   :  { %1328 = vrot.lane.b32.xlu1 (%p44_p0), %v2201_v15, %s1790_s17 }
 0xf25   : > { %v1128_v38 = vpop.permute.xlu1 %1127 }
 0xf26   : > { %v1130_v41 = vsel %vm544_vm6, %v2030_v13, %v1128_v38 }
 0xf27   : > { %1553 = vmatmul.mubr.msk.f32.vlgmr.msra.gmra.mxu1 %vm1139_vm11, %v1130_v41 }
 0xf29   :  { %v1317_v13 = vpop.permute.xlu1 (%p44_p0), %1316 }
 0xf2a   :  { %v1336_v47 = vsel (%p44_p0), %vm753_vm8, %v1334_v28, %v1317_v13 }
 0xf2d   :  { %v1321_v9 = vpop.permute.xlu1 (%p44_p0), %1320 }
 0xf2e   :  { %v1338_v23 = vsel (%p44_p0), %vm1337_vm12, %v1336_v47, %v1321_v9 }
 0xf31   :  { %v1329_v48 = vpop.permute.xlu1 (%p44_p0), %1328 }
 0xfe7   : > { %v1209_v7 = vpop.f32.mrf.mxu1 }
 0xfe8   : > { %v1210_v44 = vadd.f32 %v1209_v7, %v1138_v43  ;;  %v2202_v7 = vmov %v2201_v15  ;;  %46 = sbr.rel (!%p44_p0) target bundleno = 126 (0x7e), region = 53 }
 0xfe9   : > { %v1554_v45 = vpop.f32.mrf.mxu1 }
 0xfea   : > { %v1213_v46 = vmax.f32 %v1210_v44, 0.0  }
 0xfec   : > { %v2203_v8 = vmov %v1213_v46  ;;  %1324 = vrot.lane.b32.xlu0 (%p44_p0), %v1213_v46, %s1789_s19 }
0x105e   :  { %v1325_v39 = vpop.permute.xlu0 %1324 }
0x105f   :  { %v1340_v49 = vsel %vm1339_vm13, %v1338_v23, %v1325_v39 }
0x1060   :  { %v1342_v50 = vsel %vm1341_vm14, %v1340_v49, %v1329_v48 }
0x1061   :  { %1344 = vst.msk [vmem:[#allocation2] sm:$0xff] %vm1343_vm15, %v1342_v50 }
0x1062   :  { %1690 = shalt.err (!%p1687_p5)
}
0x1063   :  { %1356 = dma.vmem_to_hbm [thread:$0]  %s1354_s2, 128, %s2197_s5, [#allocation3]  }
0x1064   :  { %1731 = dma.done.wait [#allocation3], 128  }
0x1065   :  { %1732 = vsyncadd [#allocation3], 4294967168 }
0x1066   :  { %1362 = vsyncpa [#allocation3], 1 }

</bundles_post_ra>
